<compile_context>
chip_gen: v7x
topology: tpu7x:2x2x1
jax: 0.10.0
libtpu: 0.0.40
codegen_flags: <defaults>
</compile_context>

<pallas_src>
import functools

import jax
import jax.numpy as jnp
from jax.experimental import pallas as pl
from jax.experimental.pallas import tpu as pltpu
import numpy as np


# 3x3 tap offsets (sy, sx); t = (sy + 1) * 3 + (sx + 1) matches the HWIO
# weight flattening in _pack_conv_weights.
_TAPS = tuple((sy, sx) for sy in (-1, 0, 1) for sx in (-1, 0, 1))


def encoder_block_kernel(x_ref, w1_ref, b1_ref, w2_ref, b2_ref, m_ref, o_ref,
                         *, W):
    # x_ref  : (cin_p,  L)        L = B_TILE*H*W lanes (batch fused into lanes)
    # w1_ref : (cmid_p, 9*cin_p)  bf16 packed conv1 weights (taps folded into K)
    # b1_ref : (cmid_p, 1)        f32 conv1 bias column
    # w2_ref : (cout_p, 9*cmid_p) bf16 packed conv2 weights
    # b2_ref : (cout_p, 1)        f32 conv2 bias column
    # m_ref  : (16, L)            f32 precomputed 0/1 tap-validity masks
    #                             (rows 0..8 used, rest zero padding)
    # o_ref  : (cout_p, L)        lane-dense output block
    L = x_ref.shape[-1]
    masks = m_ref[...]                                    # (16, L), loaded once

    def im2col(a):
        # a: (C, L) -> (9*C, L).  C is a multiple of 8, so every concatenated
        # piece is sublane-tile aligned.
        pieces = []
        for t, (sy, sx) in enumerate(_TAPS):
            s = sy * W + sx
            if s == 0:
                pieces.append(a)                          # center tap: mask==1
            else:
                # XLU lane rotation along the fused spatial axis; the hoisted
                # mask zeroes SAME-padding borders / cross-image wrap-around.
                shifted = pltpu.roll(a, shift=(-s) % L, axis=1)
                pieces.append(shifted * masks[t:t + 1, :])
        return jnp.concatenate(pieces, axis=0)

    x = x_ref[...]                                        # (cin_p, L) f32

    p1 = im2col(x).astype(w1_ref.dtype)                   # bf16 MXU operand
    h1 = jnp.maximum(
        jnp.dot(w1_ref[...], p1, preferred_element_type=jnp.float32)
        + b1_ref[...], 0.0)                               # (cmid_p, L) f32

    p2 = im2col(h1).astype(w2_ref.dtype)
    h2 = jnp.maximum(
        jnp.dot(w2_ref[...], p2, preferred_element_type=jnp.float32)
        + b2_ref[...], 0.0)                               # (cout_p, L) f32

    o_ref[...] = h2.astype(o_ref.dtype)


def _round_up(x, m):
    return (x + m - 1) // m * m


def _pack_conv_weights(w_hwio, cin_pad, cout_pad):
    """(3,3,Ci,Co) HWIO weights -> (cout_pad, 9*cin_pad) lane-dense LHS.

    Column t*cin_pad + c = w[dy, dx, c, o] with t = dy*3 + dx (zero for padded
    channels), matching the im2col tap-major / channel-minor K ordering.
    """
    kh, kw, ci, co = w_hwio.shape
    w_p = jnp.pad(w_hwio, ((0, 0), (0, 0),
                           (0, cin_pad - ci), (0, cout_pad - co)))
    return jnp.transpose(w_p, (3, 0, 1, 2)).reshape(cout_pad, kh * kw * cin_pad)


def _pack_bias(b, cout_pad):
    """(1, Co) or (Co,) bias -> (cout_pad, 1) f32 column for a broadcast add."""
    b = b.reshape(-1)
    co = b.shape[0]
    return jnp.pad(b.reshape(co, 1), ((0, cout_pad - co), (0, 0))).astype(
        jnp.float32)


def _tap_masks(H, W, b_tile):
    """Host-side (16, B_TILE*H*W) 0/1 masks: rows 0..8 = per-tap validity.

    Built with col % (H*W) so taps never bleed across fused images; padded to
    16 rows for sublane-tile alignment.  Hoisted out of the kernel so the
    iota/compare/broadcast work is not redone every grid step.
    """
    HW = H * W
    L = b_tile * HW
    col = np.arange(L)
    xi = (col % HW) % W
    yi = (col % HW) // W
    rows = np.zeros((16, L), np.float32)
    for t, (sy, sx) in enumerate(_TAPS):
        rows[t] = ((xi + sx >= 0) & (xi + sx < W) &
                   (yi + sy >= 0) & (yi + sy < H)).astype(np.float32)
    return jnp.asarray(rows)


def encoder_block_forward(x_nchw, w1, b1, w2, b2, *, lane_target=1024):
    """x_nchw: (N, Cin, H, W) f32 -> (N, Cout, H, W) f32."""
    N, Cin, H, W = x_nchw.shape
    Cmid = w1.shape[-1]
    Cout = w2.shape[-1]
    HW = H * W

    cin_p = _round_up(Cin, 8)
    cmid_p = _round_up(Cmid, 8)
    cout_p = _round_up(Cout, 8)

    # Fuse B_TILE images into the lane axis so each grid step runs one wide
    # MXU matmul per conv (amortizes the ~0.35 us per-step overhead).  For
    # large N this naturally leaves >=2 "parallel" grid steps for v7x's 2 TCs.
    b_tile = min(N, max(1, lane_target // HW))
    n_tiles = (N + b_tile - 1) // b_tile
    n_pad = n_tiles * b_tile
    L = b_tile * HW

    # Lane-dense layout: channels on sublanes (padded to the 8-sublane tile),
    # fused (image, pixel) on the 128-lane axis: lane = img_in_tile*HW + pixel.
    x_flat = jnp.pad(x_nchw.reshape(N, Cin, HW),
                     ((0, n_pad - N), (0, cin_p - Cin), (0, 0)))
    x_fused = (x_flat.reshape(n_tiles, b_tile, cin_p, HW)
               .transpose(0, 2, 1, 3)
               .reshape(n_tiles, cin_p, L))

    # bf16 matmul operands (f32 MXU accumulation); biases / masks stay f32.
    w1_p = _pack_conv_weights(w1, cin_p, cmid_p).astype(jnp.bfloat16)
    w2_p = _pack_conv_weights(w2, cmid_p, cout_p).astype(jnp.bfloat16)
    b1_p = _pack_bias(b1, cmid_p)
    b2_p = _pack_bias(b2, cout_p)
    masks = _tap_masks(H, W, b_tile)

    out_fused = pl.pallas_call(
        functools.partial(encoder_block_kernel, W=W),
        out_shape=jax.ShapeDtypeStruct((n_tiles, cout_p, L), x_nchw.dtype),
        grid=(n_tiles,),
        in_specs=[
            pl.BlockSpec((None, cin_p, L), lambda t: (t, 0, 0)),
            pl.BlockSpec((cmid_p, 9 * cin_p), lambda t: (0, 0)),
            pl.BlockSpec((cmid_p, 1), lambda t: (0, 0)),
            pl.BlockSpec((cout_p, 9 * cmid_p), lambda t: (0, 0)),
            pl.BlockSpec((cout_p, 1), lambda t: (0, 0)),
            pl.BlockSpec((16, L), lambda t: (0, 0)),   # masks: fetched once
        ],
        out_specs=pl.BlockSpec((None, cout_p, L), lambda t: (t, 0, 0)),
        compiler_params=pltpu.CompilerParams(
            dimension_semantics=("parallel",)),
    )(x_fused, w1_p, b1_p, w2_p, b2_p, masks)

    out = (out_fused.reshape(n_tiles, cout_p, b_tile, HW)
           .transpose(0, 2, 1, 3)
           .reshape(n_pad, cout_p, H, W))
    return out[:N, :Cout]


def reference_forward(x_nchw, w1, b1, w2, b2):
    """Plain-JAX f32 reference (NHWC/HWIO conv) for a sanity check."""
    dn = ("NHWC", "HWIO", "NHWC")
    x = jnp.transpose(x_nchw, (0, 2, 3, 1))
    h = jax.lax.conv_general_dilated(x, w1, (1, 1), "SAME",
                                     dimension_numbers=dn)
    h = jnp.maximum(h + b1.reshape(1, 1, 1, -1), 0.0)
    h = jax.lax.conv_general_dilated(h, w2, (1, 1), "SAME",
                                     dimension_numbers=dn)
    h = jnp.maximum(h + b2.reshape(1, 1, 1, -1), 0.0)
    return jnp.transpose(h, (0, 3, 1, 2))


if __name__ == "__main__":
    # Small shapes consistent with the module: batch=2, in_channels=4,
    # out_channels=8, spatial=16x16.
    N, Cin, Cout, H, W = 2, 4, 8, 16, 16

    key = jax.random.PRNGKey(0)
    kx, kw1, kb1, kw2, kb2 = jax.random.split(key, 5)

    x = jax.random.normal(kx, (N, Cin, H, W), dtype=jnp.float32)

    # Deterministic "pre_trained" parameters (HWIO layout for the kernel).
    w1 = jax.random.normal(kw1, (3, 3, Cin, Cout), dtype=jnp.float32) * 0.1
    b1 = jax.random.normal(kb1, (1, Cout), dtype=jnp.float32) * 0.1
    w2 = jax.random.normal(kw2, (3, 3, Cout, Cout), dtype=jnp.float32) * 0.1
    b2 = jax.random.normal(kb2, (1, Cout), dtype=jnp.float32) * 0.1

    out = encoder_block_forward(x, w1, b1, w2, b2)
    out = jax.block_until_ready(out)

    ref = jax.block_until_ready(reference_forward(x, w1, b1, w2, b2))
    # Tolerance loosened vs. the pure-f32 version because the matmul operands
    # are cast to bf16 (f32 MXU accumulation), per the perf review.
    np.testing.assert_allclose(np.asarray(out), np.asarray(ref),
                               rtol=2e-2, atol=3e-2)

    print("KERNEL_OK")
</pallas_src>

<mosaic_0001>
module attributes {stable_mosaic.version = 11 : i64} {
  func.func @encoder_block_kernel(%arg0: i32, %arg1: memref<1x8x512xf32, #tpu.memory_space<vmem>>, %arg2: memref<8x72xbf16, #tpu.memory_space<vmem>>, %arg3: memref<8x1xf32, #tpu.memory_space<vmem>>, %arg4: memref<8x72xbf16, #tpu.memory_space<vmem>>, %arg5: memref<8x1xf32, #tpu.memory_space<vmem>>, %arg6: memref<16x512xf32, #tpu.memory_space<vmem>>, %arg7: memref<1x8x512xf32, #tpu.memory_space<vmem>>) attributes {dimension_semantics = [#tpu.dimension_semantics<parallel>], iteration_bounds = array<i64: 1>, scalar_prefetch = 0 : i64, scratch_operands = 0 : i64, tpu.core_type = #tpu.core_type<tc>, window_params = [{transform_indices = @transform_0, window_bounds = array<i64: 1, 8, 512>}, {pipeline_mode = #tpu.pipeline_mode<synchronous>, transform_indices = @transform_1, window_bounds = array<i64: 8, 72>}, {pipeline_mode = #tpu.pipeline_mode<synchronous>, transform_indices = @transform_2, window_bounds = array<i64: 8, 1>}, {pipeline_mode = #tpu.pipeline_mode<synchronous>, transform_indices = @transform_3, window_bounds = array<i64: 8, 72>}, {pipeline_mode = #tpu.pipeline_mode<synchronous>, transform_indices = @transform_4, window_bounds = array<i64: 8, 1>}, {pipeline_mode = #tpu.pipeline_mode<synchronous>, transform_indices = @transform_5, window_bounds = array<i64: 16, 512>}, {transform_indices = @transform_6, window_bounds = array<i64: 1, 8, 512>}]} {
    %c0 = arith.constant 0 : index
    %c0_0 = arith.constant 0 : index
    %0 = vector.load %arg6[%c0, %c0_0] : memref<16x512xf32, #tpu.memory_space<vmem>>, vector<16x512xf32>
    %c0_1 = arith.constant 0 : index
    %c0_2 = arith.constant 0 : index
    %c0_3 = arith.constant 0 : index
    %1 = vector.load %arg1[%c0_1, %c0_2, %c0_3] : memref<1x8x512xf32, #tpu.memory_space<vmem>>, vector<1x8x512xf32>
    %2 = vector.shape_cast %1 : vector<1x8x512xf32> to vector<8x512xf32>
    %c17_i32 = arith.constant 17 : i32
    %3 = tpu.dynamic_rotate %2 by %c17_i32 dim 1 : vector<8x512xf32>, i32 -> vector<8x512xf32>
    %4 = vector.extract_strided_slice %0 {offsets = [0, 0], sizes = [1, 512], strides = [1, 1]} : vector<16x512xf32> to vector<1x512xf32>
    %5 = vector.broadcast %4 : vector<1x512xf32> to vector<8x512xf32>
    %6 = arith.mulf %3, %5 : vector<8x512xf32>
    %c16_i32 = arith.constant 16 : i32
    %7 = tpu.dynamic_rotate %2 by %c16_i32 dim 1 : vector<8x512xf32>, i32 -> vector<8x512xf32>
    %8 = vector.extract_strided_slice %0 {offsets = [1, 0], sizes = [1, 512], strides = [1, 1]} : vector<16x512xf32> to vector<1x512xf32>
    %9 = vector.broadcast %8 : vector<1x512xf32> to vector<8x512xf32>
    %10 = arith.mulf %7, %9 : vector<8x512xf32>
    %c15_i32 = arith.constant 15 : i32
    %11 = tpu.dynamic_rotate %2 by %c15_i32 dim 1 : vector<8x512xf32>, i32 -> vector<8x512xf32>
    %12 = vector.extract_strided_slice %0 {offsets = [2, 0], sizes = [1, 512], strides = [1, 1]} : vector<16x512xf32> to vector<1x512xf32>
    %13 = vector.broadcast %12 : vector<1x512xf32> to vector<8x512xf32>
    %14 = arith.mulf %11, %13 : vector<8x512xf32>
    %c1_i32 = arith.constant 1 : i32
    %15 = tpu.dynamic_rotate %2 by %c1_i32 dim 1 : vector<8x512xf32>, i32 -> vector<8x512xf32>
    %16 = vector.extract_strided_slice %0 {offsets = [3, 0], sizes = [1, 512], strides = [1, 1]} : vector<16x512xf32> to vector<1x512xf32>
    %17 = vector.broadcast %16 : vector<1x512xf32> to vector<8x512xf32>
    %18 = arith.mulf %15, %17 : vector<8x512xf32>
    %c511_i32 = arith.constant 511 : i32
    %19 = tpu.dynamic_rotate %2 by %c511_i32 dim 1 : vector<8x512xf32>, i32 -> vector<8x512xf32>
    %20 = vector.extract_strided_slice %0 {offsets = [5, 0], sizes = [1, 512], strides = [1, 1]} : vector<16x512xf32> to vector<1x512xf32>
    %21 = vector.broadcast %20 : vector<1x512xf32> to vector<8x512xf32>
    %22 = arith.mulf %19, %21 : vector<8x512xf32>
    %c497_i32 = arith.constant 497 : i32
    %23 = tpu.dynamic_rotate %2 by %c497_i32 dim 1 : vector<8x512xf32>, i32 -> vector<8x512xf32>
    %24 = vector.extract_strided_slice %0 {offsets = [6, 0], sizes = [1, 512], strides = [1, 1]} : vector<16x512xf32> to vector<1x512xf32>
    %25 = vector.broadcast %24 : vector<1x512xf32> to vector<8x512xf32>
    %26 = arith.mulf %23, %25 : vector<8x512xf32>
    %c496_i32 = arith.constant 496 : i32
    %27 = tpu.dynamic_rotate %2 by %c496_i32 dim 1 : vector<8x512xf32>, i32 -> vector<8x512xf32>
    %28 = vector.extract_strided_slice %0 {offsets = [7, 0], sizes = [1, 512], strides = [1, 1]} : vector<16x512xf32> to vector<1x512xf32>
    %29 = vector.broadcast %28 : vector<1x512xf32> to vector<8x512xf32>
    %30 = arith.mulf %27, %29 : vector<8x512xf32>
    %c495_i32 = arith.constant 495 : i32
    %31 = tpu.dynamic_rotate %2 by %c495_i32 dim 1 : vector<8x512xf32>, i32 -> vector<8x512xf32>
    %32 = vector.extract_strided_slice %0 {offsets = [8, 0], sizes = [1, 512], strides = [1, 1]} : vector<16x512xf32> to vector<1x512xf32>
    %33 = vector.broadcast %32 : vector<1x512xf32> to vector<8x512xf32>
    %34 = arith.mulf %31, %33 : vector<8x512xf32>
    %35 = tpu.concatenate %6, %10, %14, %18, %2, %22, %26, %30, %34 in 0 : vector<8x512xf32>, vector<8x512xf32>, vector<8x512xf32>, vector<8x512xf32>, vector<8x512xf32>, vector<8x512xf32>, vector<8x512xf32>, vector<8x512xf32>, vector<8x512xf32> -> vector<72x512xf32>
    %36 = arith.truncf %35 : vector<72x512xf32> to vector<72x512xbf16>
    %c0_4 = arith.constant 0 : index
    %c0_5 = arith.constant 0 : index
    %37 = vector.load %arg2[%c0_4, %c0_5] : memref<8x72xbf16, #tpu.memory_space<vmem>>, vector<8x72xbf16>
    %cst = arith.constant dense<0.000000e+00> : vector<8x512xf32>
    %38 = tpu.matmul %37, %36, %cst {dimension_numbers = #tpu.dot_dimension_numbers<[1], [0], [0], [1], [0, 0, 1, 1], [], []>} : vector<8x72xbf16>, vector<72x512xbf16>, vector<8x512xf32> -> vector<8x512xf32>
    %c0_6 = arith.constant 0 : index
    %c0_7 = arith.constant 0 : index
    %39 = vector.load %arg3[%c0_6, %c0_7] : memref<8x1xf32, #tpu.memory_space<vmem>>, vector<8x1xf32>
    %40 = vector.broadcast %39 : vector<8x1xf32> to vector<8x512xf32>
    %41 = arith.addf %38, %40 : vector<8x512xf32>
    %cst_8 = arith.constant 0.000000e+00 : f32
    %42 = vector.broadcast %cst_8 : f32 to vector<8x512xf32>
    %43 = arith.maximumf %41, %42 : vector<8x512xf32>
    %c17_i32_9 = arith.constant 17 : i32
    %44 = tpu.dynamic_rotate %43 by %c17_i32_9 dim 1 : vector<8x512xf32>, i32 -> vector<8x512xf32>
    %45 = vector.extract_strided_slice %0 {offsets = [0, 0], sizes = [1, 512], strides = [1, 1]} : vector<16x512xf32> to vector<1x512xf32>
    %46 = vector.broadcast %45 : vector<1x512xf32> to vector<8x512xf32>
    %47 = arith.mulf %44, %46 : vector<8x512xf32>
    %c16_i32_10 = arith.constant 16 : i32
    %48 = tpu.dynamic_rotate %43 by %c16_i32_10 dim 1 : vector<8x512xf32>, i32 -> vector<8x512xf32>
    %49 = vector.extract_strided_slice %0 {offsets = [1, 0], sizes = [1, 512], strides = [1, 1]} : vector<16x512xf32> to vector<1x512xf32>
    %50 = vector.broadcast %49 : vector<1x512xf32> to vector<8x512xf32>
    %51 = arith.mulf %48, %50 : vector<8x512xf32>
    %c15_i32_11 = arith.constant 15 : i32
    %52 = tpu.dynamic_rotate %43 by %c15_i32_11 dim 1 : vector<8x512xf32>, i32 -> vector<8x512xf32>
    %53 = vector.extract_strided_slice %0 {offsets = [2, 0], sizes = [1, 512], strides = [1, 1]} : vector<16x512xf32> to vector<1x512xf32>
    %54 = vector.broadcast %53 : vector<1x512xf32> to vector<8x512xf32>
    %55 = arith.mulf %52, %54 : vector<8x512xf32>
    %c1_i32_12 = arith.constant 1 : i32
    %56 = tpu.dynamic_rotate %43 by %c1_i32_12 dim 1 : vector<8x512xf32>, i32 -> vector<8x512xf32>
    %57 = vector.extract_strided_slice %0 {offsets = [3, 0], sizes = [1, 512], strides = [1, 1]} : vector<16x512xf32> to vector<1x512xf32>
    %58 = vector.broadcast %57 : vector<1x512xf32> to vector<8x512xf32>
    %59 = arith.mulf %56, %58 : vector<8x512xf32>
    %c511_i32_13 = arith.constant 511 : i32
    %60 = tpu.dynamic_rotate %43 by %c511_i32_13 dim 1 : vector<8x512xf32>, i32 -> vector<8x512xf32>
    %61 = vector.extract_strided_slice %0 {offsets = [5, 0], sizes = [1, 512], strides = [1, 1]} : vector<16x512xf32> to vector<1x512xf32>
    %62 = vector.broadcast %61 : vector<1x512xf32> to vector<8x512xf32>
    %63 = arith.mulf %60, %62 : vector<8x512xf32>
    %c497_i32_14 = arith.constant 497 : i32
    %64 = tpu.dynamic_rotate %43 by %c497_i32_14 dim 1 : vector<8x512xf32>, i32 -> vector<8x512xf32>
    %65 = vector.extract_strided_slice %0 {offsets = [6, 0], sizes = [1, 512], strides = [1, 1]} : vector<16x512xf32> to vector<1x512xf32>
    %66 = vector.broadcast %65 : vector<1x512xf32> to vector<8x512xf32>
    %67 = arith.mulf %64, %66 : vector<8x512xf32>
    %c496_i32_15 = arith.constant 496 : i32
    %68 = tpu.dynamic_rotate %43 by %c496_i32_15 dim 1 : vector<8x512xf32>, i32 -> vector<8x512xf32>
    %69 = vector.extract_strided_slice %0 {offsets = [7, 0], sizes = [1, 512], strides = [1, 1]} : vector<16x512xf32> to vector<1x512xf32>
    %70 = vector.broadcast %69 : vector<1x512xf32> to vector<8x512xf32>
    %71 = arith.mulf %68, %70 : vector<8x512xf32>
    %c495_i32_16 = arith.constant 495 : i32
    %72 = tpu.dynamic_rotate %43 by %c495_i32_16 dim 1 : vector<8x512xf32>, i32 -> vector<8x512xf32>
    %73 = vector.extract_strided_slice %0 {offsets = [8, 0], sizes = [1, 512], strides = [1, 1]} : vector<16x512xf32> to vector<1x512xf32>
    %74 = vector.broadcast %73 : vector<1x512xf32> to vector<8x512xf32>
    %75 = arith.mulf %72, %74 : vector<8x512xf32>
    %76 = tpu.concatenate %47, %51, %55, %59, %43, %63, %67, %71, %75 in 0 : vector<8x512xf32>, vector<8x512xf32>, vector<8x512xf32>, vector<8x512xf32>, vector<8x512xf32>, vector<8x512xf32>, vector<8x512xf32>, vector<8x512xf32>, vector<8x512xf32> -> vector<72x512xf32>
    %77 = arith.truncf %76 : vector<72x512xf32> to vector<72x512xbf16>
    %c0_17 = arith.constant 0 : index
    %c0_18 = arith.constant 0 : index
    %78 = vector.load %arg4[%c0_17, %c0_18] : memref<8x72xbf16, #tpu.memory_space<vmem>>, vector<8x72xbf16>
    %cst_19 = arith.constant dense<0.000000e+00> : vector<8x512xf32>
    %79 = tpu.matmul %78, %77, %cst_19 {dimension_numbers = #tpu.dot_dimension_numbers<[1], [0], [0], [1], [0, 0, 1, 1], [], []>} : vector<8x72xbf16>, vector<72x512xbf16>, vector<8x512xf32> -> vector<8x512xf32>
    %c0_20 = arith.constant 0 : index
    %c0_21 = arith.constant 0 : index
    %80 = vector.load %arg5[%c0_20, %c0_21] : memref<8x1xf32, #tpu.memory_space<vmem>>, vector<8x1xf32>
    %81 = vector.broadcast %80 : vector<8x1xf32> to vector<8x512xf32>
    %82 = arith.addf %79, %81 : vector<8x512xf32>
    %cst_22 = arith.constant 0.000000e+00 : f32
    %83 = vector.broadcast %cst_22 : f32 to vector<8x512xf32>
    %84 = arith.maximumf %82, %83 : vector<8x512xf32>
    %c0_23 = arith.constant 0 : index
    %c0_24 = arith.constant 0 : index
    %c0_25 = arith.constant 0 : index
    %85 = vector.load %arg7[%c0_23, %c0_24, %c0_25] : memref<1x8x512xf32, #tpu.memory_space<vmem>>, vector<1x8x512xf32>
    %86 = vector.shape_cast %85 : vector<1x8x512xf32> to vector<8x512xf32>
    %87 = vector.shape_cast %84 : vector<8x512xf32> to vector<1x8x512xf32>
    tpu.vector_store %arg7[%c0_23, %c0_24, %c0_25], %87 {strides = array<i32>} : memref<1x8x512xf32, #tpu.memory_space<vmem>>, vector<1x8x512xf32>,
    return
  }
  func.func @transform_0(%arg0: i32) -> (i32, i32, i32) {
    %c0_i32 = arith.constant 0 : i32
    %c0_i32_0 = arith.constant 0 : i32
    %c0_i32_1 = arith.constant 0 : i32
    return %arg0, %c0_i32, %c0_i32_0 : i32, i32, i32
  }
  func.func @transform_1(%arg0: i32) -> (i32, i32) {
    %c0_i32 = arith.constant 0 : i32
    %c0_i32_0 = arith.constant 0 : i32
    %c0_i32_1 = arith.constant 0 : i32
    return %c0_i32, %c0_i32_0 : i32, i32
  }
  func.func @transform_2(%arg0: i32) -> (i32, i32) {
    %c0_i32 = arith.constant 0 : i32
    %c0_i32_0 = arith.constant 0 : i32
    %c0_i32_1 = arith.constant 0 : i32
    return %c0_i32, %c0_i32_0 : i32, i32
  }
  func.func @transform_3(%arg0: i32) -> (i32, i32) {
    %c0_i32 = arith.constant 0 : i32
    %c0_i32_0 = arith.constant 0 : i32
    %c0_i32_1 = arith.constant 0 : i32
    return %c0_i32, %c0_i32_0 : i32, i32
  }
  func.func @transform_4(%arg0: i32) -> (i32, i32) {
    %c0_i32 = arith.constant 0 : i32
    %c0_i32_0 = arith.constant 0 : i32
    %c0_i32_1 = arith.constant 0 : i32
    return %c0_i32, %c0_i32_0 : i32, i32
  }
  func.func @transform_5(%arg0: i32) -> (i32, i32) {
    %c0_i32 = arith.constant 0 : i32
    %c0_i32_0 = arith.constant 0 : i32
    %c0_i32_1 = arith.constant 0 : i32
    return %c0_i32, %c0_i32_0 : i32, i32
  }
  func.func @transform_6(%arg0: i32) -> (i32, i32, i32) {
    %c0_i32 = arith.constant 0 : i32
    %c0_i32_0 = arith.constant 0 : i32
    %c0_i32_1 = arith.constant 0 : i32
    return %arg0, %c0_i32, %c0_i32_0 : i32, i32, i32
  }
}

</mosaic_0001>

<bundles_post_ra>
// kernel: tpu_custom_call.1
= control target key start
LH: loop header
LB: loop body
LE: loop exit
PB: predicated region body
PF: predicated region fallthrough
CT: control target
= control target key end

     0   :  { %11 = vsyncpa [#allocation3], 0  ;;  %s1424_s0 = inlined_call_operand.hbm [shape: f32[1,8,512], index: 0, kind: input, shape index: {}]   ;;  %s1425_s1 = inlined_call_operand.vmem [shape: bf16[8,72], index: 1, kind: input, shape index: {}]   ;;  %s1426_s2 = inlined_call_operand.vmem [shape: f32[8,1], index: 2, kind: input, shape index: {}]   ;;  %s1427_s3 = inlined_call_operand.vmem [shape: bf16[8,72], index: 3, kind: input, shape index: {}]   ;;  %s1428_s4 = inlined_call_operand.vmem [shape: f32[8,1], index: 4, kind: input, shape index: {}]   ;;  %s1429_s5 = inlined_call_operand.hbm [shape: f32[16,512], index: 5, kind: input, shape index: {}]   ;;  %s1430_s6 = inlined_call_operand.hbm [shape: f32[1,8,512], index: 6, kind: output, shape index: {}]  }
   0x1   :  { %12 = vsyncpa [#allocation6], 0 }
   0x2   :  { %13 = vsyncpa [#allocation4], 0  ;;  %s830_s21 = smov [#allocation2]   ;;  %s831_s23 = smov [#allocation5]  }
   0x3   :  { %s20_s22 = sshll.u32 %s830_s21, 4  ;;  %s37_s24 = sshll.u32 %s831_s23, 4  ;;  %s21_s22 = int_to_ptr.vmem [resolvable:$true] %s20_s22  ;;  %s879_s24 = int_to_ptr.vmem [resolvable:$true] %s37_s24 }
   0x4   :  { %s758_s27 = scalar_lea.hbm %s1424_s0, 512 }
   0x5   :  { %p759_p0 = scmp.ne.s32.totalorder %s1424_s0, %s758_s27  ;;  %p762_p1 = scmp.lt.u32.totalorder %s758_s27, %s1424_s0 }
   0x7   :  { %p764_p2 = pnand %p762_p1, %p759_p0 }
   0x9   :  { %767 = shalt.err (!%p764_p2)
}
   0xa   :  { %s768_s8 = scalar_lea.vmem %s21_s22, 512  ;;  %p773_p4 = scmp.lt.s32.totalorder %s21_s22, %s21_s22 }
   0xb   :  { %p769_p3 = scmp.ne.s32.totalorder %s21_s22, %s768_s8  ;;  %p774_p5 = scmp.lt.s32.totalorder %s768_s8, %s768_s8 }
   0xd   :  { %p775_p6 = por %p774_p5, %p773_p4 }
   0xf   :  { %p776_p7 = pnand %p775_p6, %p769_p3 }
  0x11   :  { %779 = shalt.err (!%p776_p7)
}
  0x12   :  { %23 = dma.hbm_to_vmem [thread:$0]  %s1424_s0, 512, %s21_s22, [#allocation3]  }
  0x13   :  { %s780_s13 = scalar_lea.hbm %s1429_s5, 1024 }
  0x14   :  { %p781_p8 = scmp.ne.s32.totalorder %s1429_s5, %s780_s13  ;;  %p784_p9 = scmp.lt.u32.totalorder %s780_s13, %s1429_s5 }
  0x16   :  { %p786_p10 = pnand %p784_p9, %p781_p8 }
  0x18   :  { %789 = shalt.err (!%p786_p10)
}
  0x19   :  { %s790_s18 = scalar_lea.vmem %s879_s24, 1024  ;;  %p795_p12 = scmp.lt.s32.totalorder %s879_s24, %s879_s24 }
  0x1a   :  { %p791_p11 = scmp.ne.s32.totalorder %s879_s24, %s790_s18  ;;  %p796_p13 = scmp.lt.s32.totalorder %s790_s18, %s790_s18 }
  0x1c   :  { %p797_p0 = por %p796_p13, %p795_p12 }
  0x1e   :  { %p798_p1 = pnand %p797_p0, %p791_p11 }
  0x20   :  { %801 = shalt.err (!%p798_p1)
}
  0x21   :  { %s832_s0 = smov 512   ;;  %s833_s19 = smov 32  }
  0x22   :  { %43 = dma.hbm_to_vmem [thread:$0]  %s1429_s5, 1024, %s879_s24, [#allocation6], %s832_s0, %s832_s0, %s833_s19  }
  0x23   :  { %824 = dma.done.wait [#allocation3], 512  }
  0x24   :  { %825 = vsyncadd [#allocation3], 4294966784 }
  0x25   :  { %826 = dma.done.wait [#allocation6], 1024  }
  0x26   :  { %827 = vsyncadd [#allocation6], 4294966272  ;;  %v910_v0 = vld [vmem:[#allocation2 + $0x10] sm:$0xff]  ;;  %v912_v1 = vld [vmem:[#allocation2] sm:$0xff]  ;;  %s834_s22 = smov 17   ;;  %s835_s5 = smov 16   ;;  %v71_v6 = vlaneseq }
  0x27   :  { %67 = vrot.lane.b32.xlu1 %v910_v0, %s834_s22  ;;  %63 = vrot.lane.b32.xlu0 %v912_v1, %s834_s22  ;;  %v918_v2 = vld [vmem:[#allocation2 + $0x18] sm:$0xff]  ;;  %v920_v3 = vld [vmem:[#allocation2 + $0x8] sm:$0xff]  ;;  %s836_s23 = smov 15   ;;  %s837_s24 = smov 1   ;;  %v841_v4 = vmov 0   ;;  %v350_v5 = vld [vmem:[%s1426_s2] sm:$0xff] }
  0x28   :  { %s838_s25 = smov 127   ;;  %s839_s26 = smov 113   ;;  %405 = vmatprep.mubr.bf16.mxu0 %v841_v4  ;;  %446 = vmatprep.mubr.bf16.mxu1 %v841_v4  ;;  %v988_v7 = vshrl.u32 %v71_v6, 7  ;;  %v990_v10 = vand.u32 127, %v71_v6  ;;  %v996_v13 = vld [vmem:[#allocation5 + $0x8] sm:$0xff]  ;;  %v999_v16 = vld [vmem:[#allocation5] sm:$0xff] }
  0x29   :  { %s840_s27 = smov 112   ;;  %757 = vset.pattern.permute.xlu0 %v841_v4  ;;  %s842_s28 = smov 111   ;;  %v1001_v17 = vld [vmem:[#allocation5 + $0x10] sm:$0xff]  ;;  %v1011_v20 = vld [vmem:[#allocation5 + $0x18] sm:$0xff]  ;;  %vm360_vm8 = vcmask 1043456   ;;  %vm356_vm9 = vcmask 588800  }
  0x2a   :  { %v993_v11 = vsub.s32 0, %v988_v7  ;;  %v113_v12 = vsub.s32 1, %v988_v7  ;;  %vm73_vm0 = vcmp.lt.s32.totalorder %v990_v10, 17  ;;  %vm106_vm1 = vcmp.lt.s32.totalorder %v990_v10, 16 }
  0x2b   :  { %69 = vrot.lane.b32.xlu1 %v918_v2, %s834_s22  ;;  %65 = vrot.lane.b32.xlu0 %v920_v3, %s834_s22  ;;  %v146_v53 = vsub.s32 2, %v988_v7  ;;  %v179_v54 = vsub.s32 3, %v988_v7  ;;  %vm139_vm2 = vcmp.lt.s32.totalorder %v990_v10, 15  ;;  %vm172_vm3 = vcmp.lt.s32.totalorder %v990_v10, 1 }
  0x2c   :  { %v1006_v18 = vrot.slane %v996_v13, %v993_v11  ;;  %v1009_v19 = vrot.slane %v996_v13, %v113_v12  ;;  %v1017_v22 = vrot.slane %v999_v16, %v993_v11  ;;  %v1021_v23 = vrot.slane %v1001_v17, %v993_v11 }
  0x2d   :  { %v1024_v26 = vrot.slane %v999_v16, %v113_v12  ;;  %v1031_v29 = vrot.slane %v1001_v17, %v113_v12  ;;  %v1035_v30 = vrot.slane %v1011_v20, %v993_v11  ;;  %v1042_v34 = vrot.slane %v1011_v20, %v113_v12 }
  0x2e   :  { %v1062_v57 = vrot.slane %v996_v13, %v146_v53  ;;  %v1066_v58 = vrot.slane %v996_v13, %v179_v54  ;;  %v1071_v60 = vrot.slane %v999_v16, %v146_v53  ;;  %v1074_v61 = vrot.slane %v1001_v17, %v146_v53 }
  0x2f   :  { %100 = vrot.lane.b32.xlu1 %v920_v3, %s835_s5  ;;  %98 = vrot.lane.b32.xlu0 %v912_v1, %s835_s5  ;;  %v1077_v62 = vrot.slane %v1011_v20, %v146_v53  ;;  %v1087_v12 = vrot.slane %v1001_v17, %v179_v54  ;;  %vm205_vm4 = vcmp.lt.s32.totalorder %v990_v10, 127  ;;  %vm271_vm5 = vcmp.lt.s32.totalorder %v990_v10, 112 }
  0x30   :  { %vm238_vm6 = vcmp.lt.s32.totalorder %v990_v10, 113  ;;  %vm304_vm7 = vcmp.lt.s32.totalorder %v990_v10, 111 }
  0x33   :  { %104 = vrot.lane.b32.xlu1 %v918_v2, %s835_s5  ;;  %102 = vrot.lane.b32.xlu0 %v910_v0, %s835_s5 }
  0x37   :  { %133 = vrot.lane.b32.xlu1 %v920_v3, %s836_s23  ;;  %131 = vrot.lane.b32.xlu0 %v912_v1, %s836_s23 }
  0x3b   :  { %137 = vrot.lane.b32.xlu1 %v918_v2, %s836_s23  ;;  %135 = vrot.lane.b32.xlu0 %v910_v0, %s836_s23 }
  0x3f   :  { %166 = vrot.lane.b32.xlu1 %v920_v3, %s837_s24  ;;  %164 = vrot.lane.b32.xlu0 %v912_v1, %s837_s24 }
  0x43   :  { %170 = vrot.lane.b32.xlu1 %v918_v2, %s837_s24  ;;  %168 = vrot.lane.b32.xlu0 %v910_v0, %s837_s24 }
  0x47   :  { %199 = vrot.lane.b32.xlu1 %v920_v3, %s838_s25  ;;  %197 = vrot.lane.b32.xlu0 %v912_v1, %s838_s25 }
  0x4b   :  { %203 = vrot.lane.b32.xlu1 %v918_v2, %s838_s25  ;;  %201 = vrot.lane.b32.xlu0 %v910_v0, %s838_s25 }
  0x4f   :  { %232 = vrot.lane.b32.xlu1 %v920_v3, %s839_s26  ;;  %230 = vrot.lane.b32.xlu0 %v912_v1, %s839_s26 }
  0x53   :  { %236 = vrot.lane.b32.xlu1 %v918_v2, %s839_s26  ;;  %234 = vrot.lane.b32.xlu0 %v910_v0, %s839_s26 }
  0x57   :  { %265 = vrot.lane.b32.xlu1 %v920_v3, %s840_s27  ;;  %263 = vrot.lane.b32.xlu0 %v912_v1, %s840_s27 }
  0x5b   :  { %269 = vrot.lane.b32.xlu1 %v918_v2, %s840_s27  ;;  %267 = vrot.lane.b32.xlu0 %v910_v0, %s840_s27 }
  0x5f   :  { %298 = vrot.lane.b32.xlu1 %v920_v3, %s842_s28  ;;  %296 = vrot.lane.b32.xlu0 %v912_v1, %s842_s28 }
  0x63   :  { %302 = vrot.lane.b32.xlu1 %v918_v2, %s842_s28  ;;  %300 = vrot.lane.b32.xlu0 %v910_v0, %s842_s28 }
  0x67   :  { %353 = vperm.xlu0 %757, %v350_v5  }
  0x99   :  { %v68_v8 = vpop.permute.xlu1 %67  ;;  %v64_v9 = vpop.permute.xlu0 %63 }
  0x9d   :  { %v70_v14 = vpop.permute.xlu1 %69  ;;  %v66_v15 = vpop.permute.xlu0 %65 }
  0x9e   :  { %v76_v21 = vsel %vm73_vm0, %v64_v9, %v66_v15  ;;  %v77_v27 = vsel %vm73_vm0, %v70_v14, %v64_v9  ;;  %v75_v31 = vsel %vm73_vm0, %v66_v15, %v68_v8  ;;  %v74_v35 = vsel %vm73_vm0, %v68_v8, %v70_v14 }
  0x9f   :  { %v95_v32 = vmul.f32 %v1006_v18, %v76_v21  ;;  %v94_v36 = vmul.f32 %v1017_v22, %v77_v27  ;;  %v96_v40 = vmul.f32 %v1021_v23, %v75_v31  ;;  %v97_v46 = vmul.f32 %v1035_v30, %v74_v35 }
  0xa0   :  { %v1084_v9 = vrot.slane %v999_v16, %v179_v54 }
  0xa1   :  { %v101_v24 = vpop.permute.xlu1 %100  ;;  %v99_v25 = vpop.permute.xlu0 %98 }
  0xa2   :  { %v109_v28 = vsel %vm106_vm1, %v99_v25, %v101_v24 }
  0xa3   :  { %v128_v33 = vmul.f32 %v1009_v19, %v109_v28 }
  0xa5   :  { %v105_v37 = vpop.permute.xlu1 %104  ;;  %v103_v38 = vpop.permute.xlu0 %102  ;;  %v330_v39 = vpack.c.bf16 %v128_v33, %v95_v32  ;;  %v212_v33 = vsub.s32 5, %v988_v7 }
  0xa6   :  { %v110_v41 = vsel %vm106_vm1, %v105_v37, %v99_v25  ;;  %v107_v42 = vsel %vm106_vm1, %v103_v38, %v105_v37  ;;  %v108_v43 = vsel %vm106_vm1, %v101_v24, %v103_v38  ;;  %v1094_v24 = vrot.slane %v1011_v20, %v179_v54 }
  0xa7   :  { %v127_v44 = vmul.f32 %v1024_v26, %v110_v41  ;;  %v129_v45 = vmul.f32 %v1031_v29, %v108_v43  ;;  %373 = vmatprep.subr.bf16.mxu0 %v330_v39  ;;  %v130_v47 = vmul.f32 %v1042_v34, %v107_v42 }
  0xa9   :  { %v134_v48 = vpop.permute.xlu1 %133  ;;  %v132_v49 = vpop.permute.xlu0 %131  ;;  %v329_v50 = vpack.c.bf16 %v127_v44, %v94_v36  ;;  %v332_v51 = vpack.c.bf16 %v130_v47, %v97_v46  ;;  %v331_v52 = vpack.c.bf16 %v129_v45, %v96_v40 }
  0xaa   :  { %v142_v59 = vsel %vm139_vm2, %v132_v49, %v134_v48 }
  0xab   :  { %374 = vmatpush1.bf16.msra.mxu0 %v329_v50  ;;  %414 = vmatprep.subr.bf16.mxu1 %v332_v51  ;;  %v161_v14 = vmul.f32 %v1062_v57, %v142_v59  ;;  %v1121_v51 = vrot.slane %v996_v13, %v212_v33 }
  0xac   :  { %415 = vmatpush1.bf16.msra.mxu1 %v331_v52  ;;  %v1124_v52 = vrot.slane %v1001_v17, %v212_v33 }
  0xad   :  { %v138_v55 = vpop.permute.xlu1 %137  ;;  %v136_v56 = vpop.permute.xlu0 %135 }
  0xae   :  { %v143_v6 = vsel %vm139_vm2, %v138_v55, %v132_v49  ;;  %v141_v15 = vsel %vm139_vm2, %v134_v48, %v136_v56  ;;  %v140_v25 = vsel %vm139_vm2, %v136_v56, %v138_v55  ;;  %v1113_v48 = vrot.slane %v999_v16, %v212_v33 }
  0xaf   :  { %v160_v27 = vmul.f32 %v1071_v60, %v143_v6  ;;  %v162_v35 = vmul.f32 %v1074_v61, %v141_v15  ;;  %v163_v39 = vmul.f32 %v1077_v62, %v140_v25  ;;  %v1116_v49 = vrot.slane %v1011_v20, %v212_v33 }
  0xb0   :  { %v278_v33 = vsub.s32 7, %v988_v7 }
  0xb1   :  { %v167_v63 = vpop.permute.xlu1 %166  ;;  %v165_v5 = vpop.permute.xlu0 %164 }
  0xb2   :  { %v175_v8 = vsel %vm172_vm3, %v165_v5, %v167_v63 }
  0xb3   :  { %v194_v21 = vmul.f32 %v1066_v58, %v175_v8 }
  0xb5   :  { %v171_v28 = vpop.permute.xlu1 %170  ;;  %v169_v31 = vpop.permute.xlu0 %168  ;;  %v334_v32 = vpack.c.bf16 %v194_v21, %v161_v14 }
  0xb6   :  { %v176_v36 = vsel %vm172_vm3, %v171_v28, %v165_v5  ;;  %v173_v37 = vsel %vm172_vm3, %v169_v31, %v171_v28  ;;  %v174_v38 = vsel %vm172_vm3, %v167_v63, %v169_v31 }
  0xb7   :  { %v193_v40 = vmul.f32 %v1084_v9, %v176_v36  ;;  %v195_v41 = vmul.f32 %v1087_v12, %v174_v38  ;;  %v196_v42 = vmul.f32 %v1094_v24, %v173_v37  ;;  %375 = vmatprep.subr.bf16.mxu0 %v334_v32  ;;  %v1158_v38 = vrot.slane %v999_v16, %v278_v33 }
  0xb9   :  { %v200_v43 = vpop.permute.xlu1 %199  ;;  %v198_v44 = vpop.permute.xlu0 %197  ;;  %v333_v45 = vpack.c.bf16 %v193_v40, %v160_v27  ;;  %v336_v46 = vpack.c.bf16 %v196_v42, %v163_v39  ;;  %v335_v47 = vpack.c.bf16 %v195_v41, %v162_v35  ;;  %v245_v35 = vsub.s32 6, %v988_v7  ;;  %v55_v39 = vld [vmem:[#allocation5 + $0x20] sm:$0xff] }
  0xba   :  { %v208_v50 = vsel %vm205_vm4, %v198_v44, %v200_v43  ;;  %v1163_v41 = vrot.slane %v1011_v20, %v278_v33  ;;  %v1166_v42 = vrot.slane %v996_v13, %v278_v33 }
  0xbb   :  { %376 = vmatpush1.bf16.msra.mxu0 %v333_v45  ;;  %416 = vmatprep.subr.bf16.mxu1 %v336_v46  ;;  %v226_v55 = vmul.f32 %v1113_v48, %v208_v50  ;;  %v1155_v7 = vrot.slane %v1001_v17, %v245_v35 }
  0xbc   :  { %417 = vmatpush1.bf16.msra.mxu1 %v335_v47 }
  0xbd   :  { %v204_v53 = vpop.permute.xlu1 %203  ;;  %v202_v54 = vpop.permute.xlu0 %201  ;;  %v337_v28 = vpack.c.bf16 %v226_v55, %v912_v1 }
  0xbe   :  { %v209_v56 = vsel %vm205_vm4, %v204_v53, %v198_v44  ;;  %v206_v59 = vsel %vm205_vm4, %v202_v54, %v204_v53  ;;  %v207_v63 = vsel %vm205_vm4, %v200_v43, %v202_v54  ;;  %v1169_v43 = vrot.slane %v1001_v17, %v278_v33 }
  0xbf   :  { %v229_v5 = vmul.f32 %v1116_v49, %v209_v56  ;;  %v227_v6 = vmul.f32 %v1121_v51, %v207_v63  ;;  %v228_v8 = vmul.f32 %v1124_v52, %v206_v59  ;;  %v1172_v44 = vrot.slane %v999_v16, %v245_v35 }
  0xc0   :  { %v1182_v17 = vrot.slane %v55_v39, %v993_v11 }
  0xc1   :  { %v233_v14 = vpop.permute.xlu1 %232  ;;  %v231_v15 = vpop.permute.xlu0 %230  ;;  %v338_v21 = vpack.c.bf16 %v227_v6, %v920_v3  ;;  %v340_v25 = vpack.c.bf16 %v229_v5, %v918_v2  ;;  %v339_v27 = vpack.c.bf16 %v228_v8, %v910_v0  ;;  %v1145_v2 = vrot.slane %v1011_v20, %v245_v35  ;;  %v58_v6 = vld [vmem:[#allocation5 + $0x38] sm:$0xff] }
  0xc2   :  { %v1148_v0 = vrot.slane %v996_v13, %v245_v35  ;;  %v241_v46 = vsel %vm238_vm6, %v231_v15, %v233_v14  ;;  %v1199_v35 = vrot.slane %v58_v6, %v993_v11 }
  0xc3   :  { %377 = vmatprep.subr.bf16.mxu0 %v338_v21  ;;  %418 = vmatprep.subr.bf16.mxu1 %v340_v25  ;;  %v259_v8 = vmul.f32 %v1172_v44, %v241_v46 }
  0xc4   :  { %378 = vmatpush1.bf16.msra.mxu0 %v337_v28  ;;  %419 = vmatpush1.bf16.msra.mxu1 %v339_v27 }
  0xc5   :  { %v237_v31 = vpop.permute.xlu1 %236  ;;  %v235_v32 = vpop.permute.xlu0 %234 }
  0xc6   :  { %v242_v36 = vsel %vm238_vm6, %v237_v31, %v231_v15  ;;  %v240_v37 = vsel %vm238_vm6, %v233_v14, %v235_v32  ;;  %v239_v45 = vsel %vm238_vm6, %v235_v32, %v237_v31  ;;  %v56_v14 = vld [vmem:[#allocation5 + $0x28] sm:$0xff]  ;;  %v57_v15 = vld [vmem:[#allocation5 + $0x30] sm:$0xff] }
  0xc7   :  { %v262_v20 = vmul.f32 %v1145_v2, %v242_v36  ;;  %v260_v47 = vmul.f32 %v1148_v0, %v240_v37  ;;  %v261_v56 = vmul.f32 %v1155_v7, %v239_v45  ;;  %v1206_v36 = vrot.slane %v57_v15, %v993_v11 }
  0xc9   :  { %v266_v1 = vpop.permute.xlu1 %265  ;;  %v264_v3 = vpop.permute.xlu0 %263 }
  0xca   :  { %v274_v40 = vsel %vm271_vm5, %v264_v3, %v266_v1 }
  0xcb   :  { %v292_v16 = vmul.f32 %v1158_v38, %v274_v40 }
  0xcd   :  { %v270_v13 = vpop.permute.xlu1 %269  ;;  %v268_v50 = vpop.permute.xlu0 %267  ;;  %v341_v33 = vpack.c.bf16 %v292_v16, %v259_v8 }
  0xce   :  { %v275_v53 = vsel %vm271_vm5, %v270_v13, %v264_v3  ;;  %v272_v54 = vsel %vm271_vm5, %v268_v50, %v270_v13  ;;  %v273_v55 = vsel %vm271_vm5, %v266_v1, %v268_v50  ;;  %v1203_v3 = vrot.slane %v56_v14, %v993_v11 }
  0xcf   :  { %v295_v59 = vmul.f32 %v1163_v41, %v275_v53  ;;  %v293_v63 = vmul.f32 %v1166_v42, %v273_v55  ;;  %v294_v5 = vmul.f32 %v1169_v43, %v272_v54 }
  0xd1   :  { %v299_v21 = vpop.permute.xlu1 %298  ;;  %v297_v25 = vpop.permute.xlu0 %296  ;;  %v342_v27 = vpack.c.bf16 %v293_v63, %v260_v47  ;;  %v344_v28 = vpack.c.bf16 %v295_v59, %v262_v20  ;;  %v343_v31 = vpack.c.bf16 %v294_v5, %v261_v56  ;;  %v349_v56 = vld [vmem:[%s1425_s1] sm:$0xf] }
  0xd2   :  { %v307_v32 = vsel %vm304_vm7, %v297_v25, %v299_v21 }
  0xd3   :  { %v325_v1 = vmul.f32 %v1182_v17, %v307_v32  ;;  %379 = vmatprep.subr.bf16.mxu0 %v342_v27  ;;  %420 = vmatprep.subr.bf16.mxu1 %v344_v28 }
  0xd4   :  { %380 = vmatpush1.bf16.msra.mxu0 %v341_v33  ;;  %421 = vmatpush1.bf16.msra.mxu1 %v343_v31 }
  0xd5   :  { %v303_v37 = vpop.permute.xlu1 %302  ;;  %v301_v39 = vpop.permute.xlu0 %300  ;;  %v345_v20 = vpack.c.bf16 %v325_v1, %v325_v1 }
  0xd6   :  { %v308_v40 = vsel %vm304_vm7, %v303_v37, %v297_v25  ;;  %v305_v45 = vsel %vm304_vm7, %v301_v39, %v303_v37  ;;  %v306_v46 = vsel %vm304_vm7, %v299_v21, %v301_v39  ;;  %v608_v39 = vld [vmem:[%s1428_s4] sm:$0xff] }
  0xd7   :  { %v328_v47 = vmul.f32 %v1199_v35, %v308_v40  ;;  %v326_v13 = vmul.f32 %v1203_v3, %v306_v46  ;;  %v327_v11 = vmul.f32 %v1206_v36, %v305_v45  ;;  %v362_v54 = vsel %vm360_vm8, %v345_v20, 0 }
  0xd9   :  { %v348_v50 = vpack.c.bf16 %v328_v47, %v328_v47  ;;  %v346_v16 = vpack.c.bf16 %v326_v13, %v326_v13  ;;  %v347_v53 = vpack.c.bf16 %v327_v11, %v327_v11 }
  0xdb   :  { %735 = vmatprep.subr.msk.bf16.mxu0 %vm360_vm8, %v346_v16  ;;  %737 = vmatprep.subr.msk.bf16.mxu1 %vm360_vm8, %v348_v50  ;;  %v368_v55 = vsel %vm360_vm8, %v347_v53, 0 }
  0xdc   :  { %382 = vmatpush1.bf16.msra.mxu0 %v362_v54  ;;  %423 = vmatpush1.bf16.msra.mxu1 %v368_v55 }
  0xdf   :  { %736 = vmatmul.mubr.msk.bf16.vlgmr.msra.gmra.mrb[0].mxu0 %vm356_vm9, %v349_v56  ;;  %738 = vmatmul.mubr.msk.bf16.vlgmr.msra.gmra.mrb[0].mxu1 %vm356_vm9, %v349_v56 }
  0xe0   :  { %661 = vmatprep.mubr.bf16.mxu0 %v841_v4  ;;  %702 = vmatprep.mubr.bf16.mxu1 %v841_v4 }
  0xe6   :  { %v354_v59 = vpop.permute.xlu0 %353 }
 0x1b2   :  { %v407_v63 = vpop.f32.mrb[0].mxu0  ;;  %v448_v5 = vpop.f32.mrb[0].mxu1 }
 0x1b3   :  { %v408_v6 = vadd.f32 %v407_v63, %v354_v59  ;;  %v449_v8 = vadd.f32 %v448_v5, %v354_v59  ;;  %v409_v14 = vpop.f32.mrb[1].mxu0  ;;  %v450_v15 = vpop.f32.mrb[1].mxu1 }
 0x1b4   :  { %v411_v21 = vpop.f32.mrb[2].mxu0  ;;  %v452_v25 = vpop.f32.mrb[2].mxu1  ;;  %v410_v31 = vadd.f32 %v409_v14, %v354_v59  ;;  %v451_v1 = vadd.f32 %v450_v15, %v354_v59 }
 0x1b5   :  { %v1228_v27 = vmax.f32 %v408_v6, 0.0  ;;  %v1230_v28 = vmax.f32 %v449_v8, 0.0  ;;  %v412_v32 = vpop.f32.mrb[3].mxu0  ;;  %v453_v33 = vpop.f32.mrb[3].mxu1 }
 0x1b6   :  { %v1236_v4 = vmax.f32 %v410_v31, 0.0  ;;  %v1242_v37 = vmax.f32 %v451_v1, 0.0 }
 0x1b7   :  { %463 = vrot.lane.b32.xlu0 %v1230_v28, %s834_s22  ;;  %459 = vrot.lane.b32.xlu1 %v1228_v27, %s834_s22 }
 0x1bb   :  { %475 = vrot.lane.b32.xlu0 %v1228_v27, %s835_s5  ;;  %461 = vrot.lane.b32.xlu1 %v1236_v4, %s834_s22 }
 0x1bf   :  { %479 = vrot.lane.b32.xlu0 %v1230_v28, %s835_s5  ;;  %465 = vrot.lane.b32.xlu1 %v1242_v37, %s834_s22 }
 0x1c3   :  { %491 = vrot.lane.b32.xlu0 %v1228_v27, %s836_s23  ;;  %477 = vrot.lane.b32.xlu1 %v1236_v4, %s835_s5 }
 0x1c7   :  { %495 = vrot.lane.b32.xlu0 %v1230_v28, %s836_s23  ;;  %481 = vrot.lane.b32.xlu1 %v1242_v37, %s835_s5 }
 0x1cb   :  { %507 = vrot.lane.b32.xlu0 %v1228_v27, %s837_s24  ;;  %493 = vrot.lane.b32.xlu1 %v1236_v4, %s836_s23 }
 0x1cf   :  { %511 = vrot.lane.b32.xlu0 %v1230_v28, %s837_s24  ;;  %497 = vrot.lane.b32.xlu1 %v1242_v37, %s836_s23 }
 0x1d3   :  { %523 = vrot.lane.b32.xlu0 %v1228_v27, %s838_s25  ;;  %509 = vrot.lane.b32.xlu1 %v1236_v4, %s837_s24 }
 0x1d7   :  { %527 = vrot.lane.b32.xlu0 %v1230_v28, %s838_s25  ;;  %513 = vrot.lane.b32.xlu1 %v1242_v37, %s837_s24 }
 0x1db   :  { %539 = vrot.lane.b32.xlu0 %v1228_v27, %s839_s26  ;;  %525 = vrot.lane.b32.xlu1 %v1236_v4, %s838_s25 }
 0x1df   :  { %543 = vrot.lane.b32.xlu0 %v1230_v28, %s839_s26  ;;  %529 = vrot.lane.b32.xlu1 %v1242_v37, %s838_s25 }
 0x1e3   :  { %555 = vrot.lane.b32.xlu0 %v1228_v27, %s840_s27  ;;  %541 = vrot.lane.b32.xlu1 %v1236_v4, %s839_s26 }
 0x1e7   :  { %559 = vrot.lane.b32.xlu0 %v1230_v28, %s840_s27  ;;  %545 = vrot.lane.b32.xlu1 %v1242_v37, %s839_s26 }
 0x1eb   :  { %571 = vrot.lane.b32.xlu0 %v1228_v27, %s842_s28  ;;  %557 = vrot.lane.b32.xlu1 %v1236_v4, %s840_s27 }
 0x1ef   :  { %575 = vrot.lane.b32.xlu0 %v1230_v28, %s842_s28  ;;  %561 = vrot.lane.b32.xlu1 %v1242_v37, %s840_s27 }
 0x1f3   :  { %611 = vperm.xlu0 %757, %v608_v39   ;;  %573 = vrot.lane.b32.xlu1 %v1236_v4, %s842_s28 }
 0x1f7   :  { %577 = vrot.lane.b32.xlu1 %v1242_v37, %s842_s28 }
 0x229   :  { %v464_v40 = vpop.permute.xlu0 %463  ;;  %v460_v45 = vpop.permute.xlu1 %459 }
 0x22d   :  { %v476_v46 = vpop.permute.xlu0 %475  ;;  %v462_v20 = vpop.permute.xlu1 %461 }
 0x22e   :  { %v469_v11 = vsel %vm73_vm0, %v460_v45, %v462_v20  ;;  %v468_v5 = vsel %vm73_vm0, %v462_v20, %v464_v40 }
 0x22f   :  { %v472_v54 = vmul.f32 %v469_v11, %v1006_v18  ;;  %v473_v33 = vmul.f32 %v468_v5, %v1021_v23 }
 0x231   :  { %v480_v47 = vpop.permute.xlu0 %479  ;;  %v466_v13 = vpop.permute.xlu1 %465 }
 0x232   :  { %v467_v59 = vsel %vm73_vm0, %v464_v40, %v466_v13  ;;  %v470_v63 = vsel %vm73_vm0, %v466_v13, %v460_v45 }
 0x233   :  { %v471_v21 = vmul.f32 %v470_v63, %v1017_v22  ;;  %v474_v25 = vmul.f32 %v467_v59, %v1035_v30 }
 0x235   :  { %v492_v50 = vpop.permute.xlu0 %491  ;;  %v478_v16 = vpop.permute.xlu1 %477 }
 0x236   :  { %v485_v53 = vsel %vm106_vm1, %v476_v46, %v478_v16  ;;  %v484_v55 = vsel %vm106_vm1, %v478_v16, %v480_v47 }
 0x237   :  { %v488_v56 = vmul.f32 %v485_v53, %v1009_v19  ;;  %v489_v15 = vmul.f32 %v484_v55, %v1031_v29 }
 0x239   :  { %v496_v6 = vpop.permute.xlu0 %495  ;;  %v482_v8 = vpop.permute.xlu1 %481  ;;  %v588_v14 = vpack.c.bf16 %v488_v56, %v472_v54  ;;  %v589_v45 = vpack.c.bf16 %v489_v15, %v473_v33 }
 0x23a   :  { %v483_v18 = vsel %vm106_vm1, %v480_v47, %v482_v8  ;;  %v486_v19 = vsel %vm106_vm1, %v482_v8, %v476_v46 }
 0x23b   :  { %v487_v31 = vmul.f32 %v486_v19, %v1024_v26  ;;  %v490_v32 = vmul.f32 %v483_v18, %v1042_v34  ;;  %629 = vmatprep.subr.bf16.mxu0 %v588_v14 }
 0x23d   :  { %v587_v1 = vpack.c.bf16 %v487_v31, %v471_v21  ;;  %v508_v39 = vpop.permute.xlu0 %507  ;;  %v494_v29 = vpop.permute.xlu1 %493  ;;  %v590_v40 = vpack.c.bf16 %v490_v32, %v474_v25 }
 0x23e   :  { %v501_v22 = vsel %vm139_vm2, %v492_v50, %v494_v29  ;;  %v500_v53 = vsel %vm139_vm2, %v494_v29, %v496_v6 }
 0x23f   :  { %630 = vmatpush1.bf16.msra.mxu0 %v587_v1  ;;  %670 = vmatprep.subr.bf16.mxu1 %v590_v40  ;;  %v504_v23 = vmul.f32 %v501_v22, %v1062_v57 }
 0x240   :  { %671 = vmatpush1.bf16.msra.mxu1 %v589_v45 }
 0x241   :  { %v512_v46 = vpop.permute.xlu0 %511  ;;  %v498_v20 = vpop.permute.xlu1 %497 }
 0x242   :  { %v499_v11 = vsel %vm139_vm2, %v496_v6, %v498_v20  ;;  %v502_v16 = vsel %vm139_vm2, %v498_v20, %v492_v50  ;;  %v505_v6 = vmul.f32 %v500_v53, %v1074_v61 }
 0x243   :  { %v503_v63 = vmul.f32 %v502_v16, %v1071_v60  ;;  %v506_v5 = vmul.f32 %v499_v11, %v1077_v62 }
 0x245   :  { %v524_v30 = vpop.permute.xlu0 %523  ;;  %v510_v26 = vpop.permute.xlu1 %509 }
 0x246   :  { %v517_v34 = vsel %vm172_vm3, %v508_v39, %v510_v26  ;;  %v516_v47 = vsel %vm172_vm3, %v510_v26, %v512_v46 }
 0x247   :  { %v520_v13 = vmul.f32 %v517_v34, %v1066_v58  ;;  %v521_v59 = vmul.f32 %v516_v47, %v1087_v12 }
 0x249   :  { %v528_v54 = vpop.permute.xlu0 %527  ;;  %v514_v55 = vpop.permute.xlu1 %513  ;;  %v592_v56 = vpack.c.bf16 %v520_v13, %v504_v23  ;;  %v593_v19 = vpack.c.bf16 %v521_v59, %v505_v6 }
 0x24a   :  { %v515_v57 = vsel %vm172_vm3, %v512_v46, %v514_v55  ;;  %v518_v58 = vsel %vm172_vm3, %v514_v55, %v508_v39 }
 0x24b   :  { %v519_v50 = vmul.f32 %v518_v58, %v1084_v9  ;;  %v522_v8 = vmul.f32 %v515_v57, %v1094_v24  ;;  %631 = vmatprep.subr.bf16.mxu0 %v592_v56 }
 0x24d   :  { %v591_v14 = vpack.c.bf16 %v519_v50, %v503_v63  ;;  %v540_v15 = vpop.permute.xlu0 %539  ;;  %v526_v12 = vpop.permute.xlu1 %525  ;;  %v594_v18 = vpack.c.bf16 %v522_v8, %v506_v5 }
 0x24e   :  { %v532_v21 = vsel %vm205_vm4, %v526_v12, %v528_v54  ;;  %v533_v60 = vsel %vm205_vm4, %v524_v30, %v526_v12 }
 0x24f   :  { %v535_v62 = vmul.f32 %v533_v60, %v1113_v48  ;;  %v536_v9 = vmul.f32 %v532_v21, %v1121_v51  ;;  %632 = vmatpush1.bf16.msra.mxu0 %v591_v14  ;;  %672 = vmatprep.subr.bf16.mxu1 %v594_v18 }
 0x250   :  { %673 = vmatpush1.bf16.msra.mxu1 %v593_v19 }
 0x251   :  { %v595_v61 = vpack.c.bf16 %v535_v62, %v1228_v27  ;;  %v544_v24 = vpop.permute.xlu0 %543  ;;  %v530_v25 = vpop.permute.xlu1 %529  ;;  %v596_v31 = vpack.c.bf16 %v536_v9, %v1236_v4 }
 0x252   :  { %v531_v32 = vsel %vm205_vm4, %v528_v54, %v530_v25  ;;  %v534_v33 = vsel %vm205_vm4, %v530_v25, %v524_v30 }
 0x253   :  { %v537_v1 = vmul.f32 %v531_v32, %v1124_v52  ;;  %v538_v48 = vmul.f32 %v534_v33, %v1116_v49  ;;  %633 = vmatprep.subr.bf16.mxu0 %v596_v31 }
 0x254   :  { %634 = vmatpush1.bf16.msra.mxu0 %v595_v61 }
 0x255   :  { %v597_v51 = vpack.c.bf16 %v537_v1, %v1230_v28  ;;  %v556_v39 = vpop.permute.xlu0 %555  ;;  %v542_v27 = vpop.permute.xlu1 %541  ;;  %v598_v29 = vpack.c.bf16 %v538_v48, %v1242_v37 }
 0x256   :  { %v548_v45 = vsel %vm238_vm6, %v542_v27, %v544_v24  ;;  %v549_v52 = vsel %vm238_vm6, %v540_v15, %v542_v27 }
 0x257   :  { %674 = vmatprep.subr.bf16.mxu1 %v598_v29  ;;  %v551_v20 = vmul.f32 %v549_v52, %v1172_v44  ;;  %v552_v37 = vmul.f32 %v548_v45, %v1148_v0 }
 0x258   :  { %675 = vmatpush1.bf16.msra.mxu1 %v597_v51 }
 0x259   :  { %v560_v4 = vpop.permute.xlu0 %559  ;;  %v546_v40 = vpop.permute.xlu1 %545 }
 0x25a   :  { %v547_v34 = vsel %vm238_vm6, %v544_v24, %v546_v40  ;;  %v550_v23 = vsel %vm238_vm6, %v546_v40, %v540_v15 }
 0x25b   :  { %v553_v44 = vmul.f32 %v547_v34, %v1155_v7 }
 0x25d   :  { %v558_v46 = vpop.permute.xlu1 %557  ;;  %v572_v22 = vpop.permute.xlu0 %571 }
 0x25e   :  { %v564_v49 = vsel %vm271_vm5, %v558_v46, %v560_v4  ;;  %v565_v28 = vsel %vm271_vm5, %v556_v39, %v558_v46 }
 0x25f   :  { %v567_v30 = vmul.f32 %v565_v28, %v1158_v38  ;;  %v568_v26 = vmul.f32 %v564_v49, %v1166_v42  ;;  %v554_v38 = vmul.f32 %v550_v23, %v1145_v2 }
 0x261   :  { %v599_v47 = vpack.c.bf16 %v567_v30, %v551_v20  ;;  %v562_v13 = vpop.permute.xlu1 %561  ;;  %v600_v11 = vpack.c.bf16 %v568_v26, %v552_v37  ;;  %v576_v54 = vpop.permute.xlu0 %575 }
 0x262   :  { %v563_v16 = vsel %vm271_vm5, %v560_v4, %v562_v13  ;;  %v566_v0 = vsel %vm271_vm5, %v562_v13, %v556_v39 }
 0x263   :  { %v569_v42 = vmul.f32 %v563_v16, %v1169_v43  ;;  %v570_v53 = vmul.f32 %v566_v0, %v1163_v41  ;;  %635 = vmatprep.subr.bf16.mxu0 %v600_v11 }
 0x264   :  { %636 = vmatpush1.bf16.msra.mxu0 %v599_v47 }
 0x265   :  { %v601_v55 = vpack.c.bf16 %v569_v42, %v553_v44  ;;  %v574_v56 = vpop.permute.xlu1 %573  ;;  %v602_v59 = vpack.c.bf16 %v570_v53, %v554_v38 }
 0x266   :  { %v580_v57 = vsel %vm304_vm7, %v574_v56, %v576_v54  ;;  %v581_v58 = vsel %vm304_vm7, %v572_v22, %v574_v56 }
 0x267   :  { %v583_v7 = vmul.f32 %v581_v58, %v1182_v17  ;;  %v584_v2 = vmul.f32 %v580_v57, %v1203_v3  ;;  %676 = vmatprep.subr.bf16.mxu1 %v602_v59  ;;  %v607_v3 = vld [vmem:[%s1427_s3] sm:$0xf]  ;;  %s843_s3 = smov [#allocation7]  }
 0x268   :  { %677 = vmatpush1.bf16.msra.mxu1 %v601_v55  ;;  %s725_s10 = sshll.u32 %s843_s3, 4  ;;  %s726_s10 = int_to_ptr.vmem [resolvable:$true] %s725_s10 }
 0x269   :  { %v603_v43 = vpack.c.bf16 %v583_v7, %v583_v7  ;;  %v604_v41 = vpack.c.bf16 %v584_v2, %v584_v2  ;;  %v578_v63 = vpop.permute.xlu1 %577  ;;  %s802_s11 = scalar_lea.vmem %s726_s10, 512  ;;  %p807_p3 = scmp.lt.s32.totalorder %s726_s10, %s726_s10 }
 0x26a   :  { %v579_v5 = vsel %vm304_vm7, %v576_v54, %v578_v63  ;;  %v582_v50 = vsel %vm304_vm7, %v578_v63, %v572_v22  ;;  %p803_p2 = scmp.ne.s32.totalorder %s726_s10, %s802_s11  ;;  %p808_p4 = scmp.lt.s32.totalorder %s802_s11, %s802_s11 }
 0x26b   :  { %v585_v8 = vmul.f32 %v579_v5, %v1206_v36  ;;  %v586_v6 = vmul.f32 %v582_v50, %v1199_v35  ;;  %739 = vmatprep.subr.msk.bf16.mxu0 %vm360_vm8, %v604_v41  ;;  %v618_v17 = vsel %vm360_vm8, %v603_v43, 0 }
 0x26c   :  { %638 = vmatpush1.bf16.msra.mxu0 %v618_v17  ;;  %p809_p5 = por %p808_p4, %p807_p3 }
 0x26d   :  { %v605_v14 = vpack.c.bf16 %v585_v8, %v585_v8  ;;  %v606_v15 = vpack.c.bf16 %v586_v6, %v586_v6 }
 0x26e   :  { %p810_p6 = pnand %p809_p5, %p803_p2 }
 0x26f   :  { %740 = vmatmul.mubr.msk.bf16.vlgmr.msra.gmra.mrb[4].mxu0 %vm356_vm9, %v607_v3  ;;  %741 = vmatprep.subr.msk.bf16.mxu1 %vm360_vm8, %v606_v15  ;;  %v624_v10 = vsel %vm360_vm8, %v605_v14, 0 }
 0x270   :  { %679 = vmatpush1.bf16.msra.mxu1 %v624_v10 }
 0x272   :  { %v612_v35 = vpop.permute.xlu0 %611 }
 0x273   :  { %742 = vmatmul.mubr.msk.bf16.vlgmr.msra.gmra.mrb[4].mxu1 %vm356_vm9, %v607_v3 }
 0x342   :  { %v663_v36 = vpop.f32.mrb[4].mxu0 }
 0x343   :  { %v664_v12 = vadd.f32 %v663_v36, %v612_v35  ;;  %v665_v18 = vpop.f32.mrb[5].mxu0 }
 0x344   :  { %v666_v19 = vadd.f32 %v665_v18, %v612_v35  ;;  %v667_v21 = vpop.f32.mrb[6].mxu0 }
 0x345   :  { %v711_v60 = vmax.f32 %v664_v12, 0.0  ;;  %v668_v62 = vpop.f32.mrb[7].mxu0 }
 0x346   :  { %v712_v9 = vmax.f32 %v666_v19, 0.0  ;;  %v704_v61 = vpop.f32.mrb[4].mxu1 }
 0x347   :  { %715 = vst [vmem:[#allocation7] sm:$0xff] %v711_v60  ;;  %v705_v24 = vadd.f32 %v704_v61, %v612_v35  ;;  %v706_v25 = vpop.f32.mrb[5].mxu1 }
 0x348   :  { %716 = vst [vmem:[#allocation7 + $0x8] sm:$0xff] %v712_v9  ;;  %v707_v31 = vadd.f32 %v706_v25, %v612_v35  ;;  %v708_v32 = vpop.f32.mrb[6].mxu1 }
 0x349   :  { %v713_v33 = vmax.f32 %v705_v24, 0.0  ;;  %v709_v1 = vpop.f32.mrb[7].mxu1 }
 0x34a   :  { %v714_v48 = vmax.f32 %v707_v31, 0.0 }
 0x34b   :  { %717 = vst [vmem:[#allocation7 + $0x10] sm:$0xff] %v713_v33 }
 0x34c   :  { %718 = vst [vmem:[#allocation7 + $0x18] sm:$0xff] %v714_v48 }
 0x34d   :  { %813 = shalt.err (!%p810_p6)
}
 0x34e   :  { %s814_s14 = scalar_lea.hbm %s1430_s6, 512 }
 0x34f   :  { %p815_p7 = scmp.ne.s32.totalorder %s1430_s6, %s814_s14  ;;  %p818_p8 = scmp.lt.u32.totalorder %s814_s14, %s1430_s6 }
 0x351   :  { %p820_p9 = pnand %p818_p8, %p815_p7 }
 0x353   :  { %823 = shalt.err (!%p820_p9)
}
 0x354   :  { %728 = dma.vmem_to_hbm [thread:$0]  %s726_s10, 512, %s1430_s6, [#allocation4]  }
 0x355   :  { %828 = dma.done.wait [#allocation4], 512  }
 0x356   :  { %829 = vsyncadd [#allocation4], 4294966784 }
 0x357   :  { %732 = vsyncpa [#allocation3], 1 }
 0x358   :  { %733 = vsyncpa [#allocation6], 1 }
 0x359   :  { %734 = vsyncpa [#allocation4], 1 }

</bundles_post_ra>
